<compile_context>
chip_gen: v6e
topology: v6e:2x2x1
jax: 0.10.0
libtpu: 0.0.40
codegen_flags: <defaults>
</compile_context>

<pallas_src>
import jax
import jax.numpy as jnp
from jax.experimental import pallas as pl
from jax.experimental.pallas import tpu as pltpu


def attention_kernel(q_ref, k_ref, wq_ref, wk_ref, wv_ref, ctx_ref, attn_ref):
    # q_ref: (TB, H), k_ref: (TB, S, H)
    # wq_ref/wk_ref: (H, H) already transposed to (in, out); wv_ref: (1, H)
    TB, S, H = k_ref.shape
    q = q_ref[...]                                   # (TB, H)
    keys = k_ref[...]                                # (TB, S, H)
    keys_flat = keys.reshape(TB * S, H)              # (TB*S, H)

    # Projections on the MXU, batched over the whole block.
    q_proj = jnp.dot(q, wq_ref[...], preferred_element_type=jnp.float32)          # (TB, H)
    k_proj = jnp.dot(keys_flat, wk_ref[...], preferred_element_type=jnp.float32)  # (TB*S, H)

    h = jnp.tanh(q_proj.reshape(TB, 1, H) + k_proj.reshape(TB, S, H))             # (TB, S, H)

    # energy[b, s] = <w_v, h[b, s, :]>  -> (TB, S); keeps S lane-dense so the
    # softmax is a lane reduce and the attention store is unmasked.
    wv_row = wv_ref[...].reshape(1, 1, H)
    energy = jnp.sum(h * wv_row, axis=-1)                                          # (TB, S)

    # Numerically-stable softmax over S (lane axis).
    m = jnp.max(energy, axis=-1, keepdims=True)                                    # (TB, 1)
    p = jnp.exp(energy - m)                                                        # (TB, S)
    denom = jnp.sum(p, axis=-1, keepdims=True)                                     # (TB, 1)
    attn = p * pl.reciprocal(denom, approx=True)                                   # (TB, S)

    # Context vector on the MXU: (TB, 1, S) @ (TB, S, H) -> (TB, 1, H).
    ctx = jnp.einsum(
        "bos,bsh->boh",
        attn[:, None, :].astype(keys.dtype),
        keys,
        preferred_element_type=jnp.float32,
    )[:, 0, :]                                                                     # (TB, H)

    ctx_ref[...] = ctx.astype(ctx_ref.dtype)
    attn_ref[...] = attn.astype(attn_ref.dtype)


def attention_forward(query, keys, wq, wk, wv, *, block_b=None):
    """query (B,H), keys (B,S,H); wq/wk (H,H), wv (1,H) in torch (out,in) layout."""
    B, S, H = keys.shape
    if block_b is None:
        block_b = 8 if B % 8 == 0 else B
    assert B % block_b == 0, "batch must be divisible by block_b"

    wq_t = wq.T  # (in, out): x @ wq_t == torch Linear(x) with weight wq
    wk_t = wk.T

    ctx, attn = pl.pallas_call(
        attention_kernel,
        out_shape=(
            jax.ShapeDtypeStruct((B, H), query.dtype),
            jax.ShapeDtypeStruct((B, S), jnp.float32),   # keep attn weights fp32
        ),
        grid_spec=pltpu.PrefetchScalarGridSpec(
            num_scalar_prefetch=0,
            grid=(B // block_b,),
            in_specs=[
                pl.BlockSpec((block_b, H), lambda b: (b, 0)),
                pl.BlockSpec((block_b, S, H), lambda b: (b, 0, 0)),
                pl.BlockSpec((H, H), lambda b: (0, 0)),
                pl.BlockSpec((H, H), lambda b: (0, 0)),
                pl.BlockSpec((1, H), lambda b: (0, 0)),
            ],
            out_specs=[
                pl.BlockSpec((block_b, H), lambda b: (b, 0)),
                pl.BlockSpec((block_b, S), lambda b: (b, 0)),
            ],
        ),
        compiler_params=pltpu.CompilerParams(
            dimension_semantics=("parallel",),
            vmem_limit_bytes=32 * 1024 * 1024,
        ),
    )(query, keys, wq_t, wk_t, wv)
    return ctx, attn


def attention_ref(query, keys, wq, wk, wv):
    """Pure-JAX reference mirroring the PyTorch forward exactly."""
    q = query[:, None, :]                                        # (B, 1, H)
    energy = jnp.tanh(q @ wq.T + keys @ wk.T) @ wv.T              # (B, S, 1)
    attention_weights = jax.nn.softmax(energy[..., 0], axis=1)    # (B, S)
    context_vector = jnp.sum(keys * attention_weights[..., None], axis=1)  # (B, H)
    return context_vector, attention_weights


if __name__ == "__main__":
    # Small shapes consistent with ALSTMModel: attention hidden = hidden_size2 = 64.
    B, S, H = 16, 16, 64
    key = jax.random.PRNGKey(0)
    k_q, k_k, k_wq, k_wk, k_wv = jax.random.split(key, 5)

    query = jax.random.normal(k_q, (B, H), dtype=jnp.float32)
    keys = jax.random.normal(k_k, (B, S, H), dtype=jnp.float32)

    # Deterministic Linear init (PyTorch default: U(-1/sqrt(fan_in), 1/sqrt(fan_in)))
    bound = 1.0 / (H ** 0.5)
    wq = jax.random.uniform(k_wq, (H, H), jnp.float32, -bound, bound)  # (out, in)
    wk = jax.random.uniform(k_wk, (H, H), jnp.float32, -bound, bound)  # (out, in)
    wv = jax.random.uniform(k_wv, (1, H), jnp.float32, -bound, bound)  # (out, in)

    ctx, attn = attention_forward(query, keys, wq, wk, wv, block_b=8)
    jax.block_until_ready((ctx, attn))

    ctx_r, attn_r = attention_ref(query, keys, wq, wk, wv)
    assert ctx.shape == (B, H) and attn.shape == (B, S)
    # Tolerance slightly relaxed because the softmax uses the EUP approx reciprocal.
    assert jnp.allclose(attn, attn_r, atol=2e-3, rtol=2e-3)
    assert jnp.allclose(ctx, ctx_r, atol=2e-3, rtol=2e-3)

    print("KERNEL_OK")
</pallas_src>

<mosaic_0001>
module attributes {stable_mosaic.version = 11 : i64} {
  func.func @attention_kernel(%arg0: i32, %arg1: memref<8x64xf32, #tpu.memory_space<vmem>>, %arg2: memref<8x16x64xf32, #tpu.memory_space<vmem>>, %arg3: memref<64x64xf32, #tpu.memory_space<vmem>>, %arg4: memref<64x64xf32, #tpu.memory_space<vmem>>, %arg5: memref<1x64xf32, #tpu.memory_space<vmem>>, %arg6: memref<8x64xf32, #tpu.memory_space<vmem>>, %arg7: memref<8x16xf32, #tpu.memory_space<vmem>>) attributes {dimension_semantics = [#tpu.dimension_semantics<parallel>], iteration_bounds = array<i64: 2>, scalar_prefetch = 0 : i64, scratch_operands = 0 : i64, tpu.core_type = #tpu.core_type<tc>, window_params = [{transform_indices = @transform_0, window_bounds = array<i64: 8, 64>}, {transform_indices = @transform_1, window_bounds = array<i64: 8, 16, 64>}, {pipeline_mode = #tpu.pipeline_mode<synchronous>, transform_indices = @transform_2, window_bounds = array<i64: 64, 64>}, {pipeline_mode = #tpu.pipeline_mode<synchronous>, transform_indices = @transform_3, window_bounds = array<i64: 64, 64>}, {pipeline_mode = #tpu.pipeline_mode<synchronous>, transform_indices = @transform_4, window_bounds = array<i64: 1, 64>}, {transform_indices = @transform_5, window_bounds = array<i64: 8, 64>}, {transform_indices = @transform_6, window_bounds = array<i64: 8, 16>}]} {
    %c0 = arith.constant 0 : index
    %c0_0 = arith.constant 0 : index
    %0 = vector.load %arg1[%c0, %c0_0] : memref<8x64xf32, #tpu.memory_space<vmem>>, vector<8x64xf32>
    %c0_1 = arith.constant 0 : index
    %c0_2 = arith.constant 0 : index
    %c0_3 = arith.constant 0 : index
    %1 = vector.load %arg2[%c0_1, %c0_2, %c0_3] : memref<8x16x64xf32, #tpu.memory_space<vmem>>, vector<8x16x64xf32>
    %2 = vector.shape_cast %1 : vector<8x16x64xf32> to vector<128x64xf32>
    %c0_4 = arith.constant 0 : index
    %c0_5 = arith.constant 0 : index
    %3 = vector.load %arg3[%c0_4, %c0_5] : memref<64x64xf32, #tpu.memory_space<vmem>>, vector<64x64xf32>
    %cst = arith.constant dense<0.000000e+00> : vector<8x64xf32>
    %4 = tpu.matmul %0, %3, %cst {dimension_numbers = #tpu.dot_dimension_numbers<[1], [0], [0], [1], [0, 0, 1, 1], [], []>} : vector<8x64xf32>, vector<64x64xf32>, vector<8x64xf32> -> vector<8x64xf32>
    %c0_6 = arith.constant 0 : index
    %c0_7 = arith.constant 0 : index
    %5 = vector.load %arg4[%c0_6, %c0_7] : memref<64x64xf32, #tpu.memory_space<vmem>>, vector<64x64xf32>
    %cst_8 = arith.constant dense<0.000000e+00> : vector<128x64xf32>
    %6 = tpu.matmul %2, %5, %cst_8 {dimension_numbers = #tpu.dot_dimension_numbers<[1], [0], [0], [1], [0, 0, 1, 1], [], []>} : vector<128x64xf32>, vector<64x64xf32>, vector<128x64xf32> -> vector<128x64xf32>
    %7 = vector.shape_cast %4 : vector<8x64xf32> to vector<8x1x64xf32>
    %8 = vector.shape_cast %6 : vector<128x64xf32> to vector<8x16x64xf32>
    %9 = vector.broadcast %7 : vector<8x1x64xf32> to vector<8x16x64xf32>
    %10 = arith.addf %9, %8 : vector<8x16x64xf32>
    %11 = math.tanh %10 : vector<8x16x64xf32>
    %c0_9 = arith.constant 0 : index
    %c0_10 = arith.constant 0 : index
    %12 = vector.load %arg5[%c0_9, %c0_10] : memref<1x64xf32, #tpu.memory_space<vmem>>, vector<1x64xf32>
    %13 = vector.shape_cast %12 : vector<1x64xf32> to vector<1x1x64xf32>
    %14 = vector.broadcast %13 : vector<1x1x64xf32> to vector<8x16x64xf32>
    %15 = arith.mulf %11, %14 : vector<8x16x64xf32>
    %cst_11 = arith.constant dense<0.000000e+00> : vector<8x16xf32>
    %16 = vector.multi_reduction <add>, %15, %cst_11 [2] : vector<8x16x64xf32> to vector<8x16xf32>
    %cst_12 = arith.constant dense<0xFF800000> : vector<8xf32>
    %17 = vector.multi_reduction <maximumf>, %16, %cst_12 [1] : vector<8x16xf32> to vector<8xf32>
    %18 = vector.shape_cast %17 : vector<8xf32> to vector<8x1xf32>
    %19 = vector.broadcast %18 : vector<8x1xf32> to vector<8x16xf32>
    %20 = arith.subf %16, %19 : vector<8x16xf32>
    %21 = math.exp %20 : vector<8x16xf32>
    %cst_13 = arith.constant dense<0.000000e+00> : vector<8xf32>
    %22 = vector.multi_reduction <add>, %21, %cst_13 [1] : vector<8x16xf32> to vector<8xf32>
    %23 = vector.shape_cast %22 : vector<8xf32> to vector<8x1xf32>
    %24 = tpu.reciprocal %23 {approx = true} : vector<8x1xf32> -> vector<8x1xf32>
    %25 = vector.broadcast %24 : vector<8x1xf32> to vector<8x16xf32>
    %26 = arith.mulf %21, %25 : vector<8x16xf32>
    %27 = vector.shape_cast %26 : vector<8x16xf32> to vector<8x1x16xf32>
    "tpu.trace_start"() <{level = 10 : i32, message = "bos,bsh->boh"}> : () -> ()
    %cst_14 = arith.constant dense<0.000000e+00> : vector<8x1x64xf32>
    %28 = tpu.matmul %27, %1, %cst_14 {dimension_numbers = #tpu.dot_dimension_numbers<[2], [1], [1], [2], [0, 0, 0, 1, 1, 2], [0], [0]>} : vector<8x1x16xf32>, vector<8x16x64xf32>, vector<8x1x64xf32> -> vector<8x1x64xf32>
    "tpu.trace_stop"() : () -> ()
    %29 = vector.shape_cast %28 : vector<8x1x64xf32> to vector<8x64xf32>
    %c0_15 = arith.constant 0 : index
    %c0_16 = arith.constant 0 : index
    %30 = vector.load %arg6[%c0_15, %c0_16] : memref<8x64xf32, #tpu.memory_space<vmem>>, vector<8x64xf32>
    tpu.vector_store %arg6[%c0_15, %c0_16], %29 {strides = array<i32>} : memref<8x64xf32, #tpu.memory_space<vmem>>, vector<8x64xf32>,
    %c0_17 = arith.constant 0 : index
    %c0_18 = arith.constant 0 : index
    %31 = vector.load %arg7[%c0_17, %c0_18] : memref<8x16xf32, #tpu.memory_space<vmem>>, vector<8x16xf32>
    tpu.vector_store %arg7[%c0_17, %c0_18], %26 {strides = array<i32>} : memref<8x16xf32, #tpu.memory_space<vmem>>, vector<8x16xf32>,
    return
  }
  func.func @transform_0(%arg0: i32) -> (i32, i32) {
    %c0_i32 = arith.constant 0 : i32
    %c0_i32_0 = arith.constant 0 : i32
    return %arg0, %c0_i32 : i32, i32
  }
  func.func @transform_1(%arg0: i32) -> (i32, i32, i32) {
    %c0_i32 = arith.constant 0 : i32
    %c0_i32_0 = arith.constant 0 : i32
    %c0_i32_1 = arith.constant 0 : i32
    return %arg0, %c0_i32, %c0_i32_0 : i32, i32, i32
  }
  func.func @transform_2(%arg0: i32) -> (i32, i32) {
    %c0_i32 = arith.constant 0 : i32
    %c0_i32_0 = arith.constant 0 : i32
    %c0_i32_1 = arith.constant 0 : i32
    return %c0_i32, %c0_i32_0 : i32, i32
  }
  func.func @transform_3(%arg0: i32) -> (i32, i32) {
    %c0_i32 = arith.constant 0 : i32
    %c0_i32_0 = arith.constant 0 : i32
    %c0_i32_1 = arith.constant 0 : i32
    return %c0_i32, %c0_i32_0 : i32, i32
  }
  func.func @transform_4(%arg0: i32) -> (i32, i32) {
    %c0_i32 = arith.constant 0 : i32
    %c0_i32_0 = arith.constant 0 : i32
    %c0_i32_1 = arith.constant 0 : i32
    return %c0_i32, %c0_i32_0 : i32, i32
  }
  func.func @transform_5(%arg0: i32) -> (i32, i32) {
    %c0_i32 = arith.constant 0 : i32
    %c0_i32_0 = arith.constant 0 : i32
    return %arg0, %c0_i32 : i32, i32
  }
  func.func @transform_6(%arg0: i32) -> (i32, i32) {
    %c0_i32 = arith.constant 0 : i32
    %c0_i32_0 = arith.constant 0 : i32
    return %arg0, %c0_i32 : i32, i32
  }
}

</mosaic_0001>

<bundles_post_ra>
// kernel: tpu_custom_call.1
= control target key start
LH: loop header
LB: loop body
LE: loop exit
PB: predicated region body
PF: predicated region fallthrough
CT: control target
= control target key end

     0   :  { %s3552_s0 = inlined_call_operand.hbm [shape: f32[16,64], index: 0, kind: input, shape index: {}]   ;;  %s3553_s1 = inlined_call_operand.hbm [shape: f32[16,16,64], index: 1, kind: input, shape index: {}]   ;;  %s3554_s2 = inlined_call_operand.hbm [shape: f32[64,64], index: 2, kind: input, shape index: {}]   ;;  %s3555_s3 = inlined_call_operand.hbm [shape: f32[64,64], index: 3, kind: input, shape index: {}]   ;;  %s3556_s4 = inlined_call_operand.vmem [shape: f32[1,64], index: 4, kind: input, shape index: {}]   ;;  %s3557_s5 = inlined_call_operand.hbm [shape: f32[16,64], index: 5, kind: output, shape index: {0}]   ;;  %s3558_s6 = inlined_call_operand.hbm [shape: f32[16,16], index: 6, kind: output, shape index: {1}]  }
   0x1   :  { %3567 = sst [smem:[#allocation19_spill]] %s3552_s0 }
   0x2   :  { %3568 = sst [smem:[#allocation20_spill]] %s3554_s2 }
   0x3   :  { %12 = vsyncpa [#allocation3], 0 }
   0x4   :  { %14 = vsyncpa [#allocation3 + $0x1], 0 }
   0x5   :  { %15 = vsyncpa [#allocation6], 0 }
   0x6   :  { %17 = vsyncpa [#allocation6 + $0x1], 0 }
   0x7   :  { %18 = vsyncpa [#allocation9], 0 }
   0x8   :  { %19 = vsyncpa [#allocation4], 0 }
   0x9   :  { %21 = vsyncpa [#allocation4 + $0x1], 0 }
   0xa   :  { %22 = vsyncpa [#allocation12], 0 }
   0xb   :  { %24 = vsyncpa [#allocation12 + $0x1], 0  ;;  %s2806_s21 = smov 0   ;;  %s2808_s22 = smov 0  }
   0xc   :  { %s2810_s23 = smov 0   ;;  %s2812_s24 = smov 0  }
   0xd LB: > { %s2827_s25 = sadd.s32 4294967295, %s2757_s24   ;;  %s2168_s26 = sadd.s32 4294967294, %s2757_s24   ;;  %s2757_s24 = sphi %s2812_s24, %s3594_s24   ;;  %s2753_s23 = sphi %s2810_s23, %s3593_s23   ;;  %s2749_s22 = sphi %s2808_s22, %s3592_s22   ;;  %s2745_s21 = sphi %s2806_s21, %s3591_s21  }
   0xe   : > { %p50_p0 = scmp.ne.s32.totalorder %s2749_s22, %s2745_s21  ;;  %p3561_p1 = scmp.eq.s32.totalorder %s2827_s25, 0 }
   0xf   : > { %p163_p2 = scmp.eq.s32.totalorder %s2827_s25, 1  ;;  %p169_p3 = scmp.eq.s32.totalorder %s2168_s26, 1 }
  0x10   : > { %p2836_p4 = por %p3561_p1, %p50_p0  ;;  %p2169_p5 = scmp.ge.s32.totalorder %s2757_s24, 1 }
  0x11   : > { %p2841_p6 = por %p169_p3, %p50_p0  ;;  %p202_p7 = scmp.lt.s32.totalorder %s2757_s24, 3 }
  0x12   : > { %s3569_s27 = scalar_select %p2836_p4, 1, 0 }
  0x13   : > { %s3570_s28 = scalar_select %p2841_p6, 1, 0 }
  0x14   : > { %p2846_p8 = pnand %p2169_p5, %p202_p7  ;;  %s2759_s30 = smov [#allocation7]  }
  0x15   : > { %s214_s7 = sshll.u32 %s2759_s30, 4  ;;  %s2760_s9 = smov [#allocation8]   ;;  %s215_s7 = int_to_ptr.vmem [resolvable:$true] %s214_s7 }
  0x16   : > { %p2408_p9 = pneg %p2846_p8  ;;  %s227_s10 = sshll.u32 %s2760_s9, 4  ;;  %s228_s10 = int_to_ptr.vmem [resolvable:$true] %s227_s10 }
  0x17   : > { %s2554_s11 = scalar_lea.vmem %s215_s7, 1024  ;;  %p2562_p5 = scmp.lt.s32.totalorder %s215_s7, %s215_s7 }
  0x18   : > { %p2855_p11 = pnand %p2408_p9, %p3561_p1  ;;  %p2555_p13 = scmp.ne.s32.totalorder %s215_s7, %s2554_s11 }
  0x19   : > { %p2563_p7 = scmp.lt.s32.totalorder %s2554_s11, %s2554_s11 }
  0x1a   : > { %p2545_p12 = pneg %p2855_p11 }
  0x1b   : > { %p2564_p10 = por %p2563_p7, %p2562_p5 }
  0x1c   : > { %p2557_p0 = pnand %p2555_p13, %p2545_p12 }
  0x1e   : > { %p2558_p3 = pneg %p2557_p0 }
  0x20   : > { %p2565_p9 = pnand %p2564_p10, %p2558_p3 }
  0x22   : > { %2568 = shalt.err (!%p2565_p9)
}
  0x23   : > { %s3559_s12 = smov 128   ;;  %s3560_s13 = smov 8  }
  0x24   : > { %s3573_s2 = sld [smem:[#allocation20_spill]]  ;;  %s2580_s16 = scalar_lea.vmem %s228_s10, 1024 }
  0x25   : > { %p2581_p13 = scmp.ne.s32.totalorder %s228_s10, %s2580_s16  ;;  %p2588_p10 = scmp.lt.s32.totalorder %s228_s10, %s228_s10 }
  0x26   : > { %p2589_p3 = scmp.lt.s32.totalorder %s2580_s16, %s2580_s16 }
  0x27   : > { %p2583_p0 = pnand %p2581_p13, %p2545_p12 }
  0x28   : > { %p2590_p7 = por %p2589_p3, %p2588_p10 }
  0x29   : > { %p2584_p5 = pneg %p2583_p0 }
  0x2a   : > { %2411 = dma.hbm_to_vmem [thread:$0]  (!%p2855_p11), %s3573_s2, 1024, %s215_s7, [#allocation6], %s3559_s12, %s3559_s12, %s3560_s13  }
  0x2b   : > { %p2591_p9 = pnand %p2590_p7, %p2584_p5 }
  0x2d   : > { %2594 = shalt.err (!%p2591_p9)
}
  0x2e   : > { %2414 = dma.hbm_to_vmem [thread:$0]  (!%p2855_p11), %s3555_s3, 1024, %s228_s10, [#allocation9], %s3559_s12, %s3559_s12, %s3560_s13  }
  0x2f   : > { %s2884_s19 = sadd.s32 1, %s2757_s24   ;;  %s37_s20 = sadd.s32 1, %s2753_s23 }
  0x30   : > { %s34_s26 = ssub.s32 %s2757_s24, %s2884_s19  ;;  %p44_p12 = scmp.ne.s32.totalorder %s2753_s23, %s2749_s22 }
  0x31   : > { %p35_p13 = scmp.eq.s32.totalorder %s34_s26, 0  ;;  %p45_p0 = scmp.eq.s32.totalorder %s2757_s24, 0 }
  0x32   : > { %p2894_p5 = por %p163_p2, %p44_p12  ;;  %p2431_p10 = scmp.lt.s32.totalorder %s2757_s24, 2 }
  0x33   : > { %s2900_s7 = scalar_select %p35_p13, %s2753_s23, %s37_s20  }
  0x34   : > { %s3574_s30 = scalar_select %p2894_p5, 1, 0 }
  0x35   : > { %p46_p3 = por %p45_p0, %p44_p12  ;;  %s2903_s8 = sand.u32 1, %s2753_s23  }
  0x36   : > { %s2173_s9 = sshll.u32 %s2903_s8, 3  ;;  %s2174_s10 = sshll.u32 %s2757_s24, 7 }
  0x37   : > { %s3575_s0 = sld [smem:[#allocation19_spill]]  ;;  %s248_s16 = scalar_lea.vmem [#allocation2], %s2173_s9 }
  0x38   : > { %s255_s17 = sshll.u32 %s248_s16, 4  ;;  %p2914_p2 = pnand %p2431_p10, %p46_p3  ;;  %s2912_s17 = int_to_ptr.vmem [resolvable:$true] %s255_s17 }
  0x39   : > { %s245_s12 = scalar_lea.sflag [#allocation3], %s2903_s8 }
  0x3a   : > { %p2597_p7 = pneg %p2914_p2 }
  0x3d   : > { %s2910_s15 = scalar_lea.hbm %s3575_s0, %s2174_s10  ;;  %s2600_s11 = scalar_lea.hbm %s3575_s0, 256 }
  0x3e   : > { %s2595_s13 = scalar_lea.hbm %s2910_s15, 128  ;;  %p2601_p13 = scmp.lt.s32.totalorder %s2910_s15, %s3575_s0 }
  0x3f   : > { %p2596_p11 = scmp.ne.s32.totalorder %s2910_s15, %s2595_s13  ;;  %p2602_p0 = scmp.lt.s32.totalorder %s2600_s11, %s2595_s13 }
  0x41   : > { %p2598_p9 = pnand %p2597_p7, %p2596_p11  ;;  %p2603_p10 = por %p2602_p0, %p2601_p13 }
  0x43   : > { %p2599_p12 = pneg %p2598_p9 }
  0x45   : > { %p2604_p3 = pnand %p2603_p10, %p2599_p12 }
  0x47   : > { %2607 = shalt.err (!%p2604_p3)
}
  0x48   : > { %s2608_s26 = scalar_lea.vmem %s2912_s17, 128  ;;  %s2763_s9 = smov [#allocation2]  }
  0x49   : > { %p2609_p1 = scmp.ne.s32.totalorder %s2912_s17, %s2608_s26  ;;  %s2613_s10 = sshll.u32 %s2763_s9, 4  ;;  %s2614_s10 = int_to_ptr.vmem [resolvable:$false] %s2613_s10 }
  0x4a   : > { %s2615_s20 = scalar_lea.vmem %s2614_s10, 256  ;;  %p2616_p6 = scmp.lt.s32.totalorder %s2912_s17, %s2614_s10 }
  0x4b   : > { %p2611_p11 = pnand %p2609_p1, %p2597_p7  ;;  %p2617_p5 = scmp.lt.s32.totalorder %s2615_s20, %s2608_s26 }
  0x4d   : > { %p2612_p9 = pneg %p2611_p11  ;;  %p2618_p4 = por %p2617_p5, %p2616_p6 }
  0x4f   : > { %p2619_p13 = pnand %p2618_p4, %p2612_p9 }
  0x51   : > { %2622 = shalt.err (!%p2619_p13)
}
  0x52   : > { %2418 = dma.hbm_to_vmem [thread:$0]  (!%p2914_p2), %s2910_s15, 128, %s2912_s17, %s245_s12  }
  0x53   : > { %s3577_s13 = sshll.u32 %s2903_s8, 7  ;;  %s2219_s16 = sshll.u32 %s2757_s24, 11 }
  0x54   : > { %s266_s11 = scalar_lea.vmem [#allocation5], %s3577_s13  ;;  %s2953_s26 = scalar_lea.hbm %s3553_s1, %s2219_s16 }
  0x55   : > { %s274_s14 = sshll.u32 %s266_s11, 4  ;;  %s3578_s10 = sand.u32 1, %s2757_s24   ;;  %s2947_s14 = int_to_ptr.vmem [resolvable:$true] %s274_s14 }
  0x56   : > { %s263_s0 = scalar_lea.sflag [#allocation6], %s3578_s10  ;;  %s2623_s2 = scalar_lea.hbm %s2953_s26, 2048 }
  0x57   : > { %p2624_p1 = scmp.ne.s32.totalorder %s2953_s26, %s2623_s2  ;;  %s2628_s15 = scalar_lea.hbm %s3553_s1, 4096 }
  0x58   : > { %p2629_p5 = scmp.lt.s32.totalorder %s2953_s26, %s3553_s1  ;;  %p2630_p12 = scmp.lt.s32.totalorder %s2628_s15, %s2623_s2 }
  0x59   : > { %p2626_p4 = pnand %p2624_p1, %p2597_p7 }
  0x5a   : > { %p2631_p0 = por %p2630_p12, %p2629_p5 }
  0x5b   : > { %p2627_p6 = pneg %p2626_p4 }
  0x5d   : > { %p2632_p10 = pnand %p2631_p0, %p2627_p6 }
  0x5f   : > { %2635 = shalt.err (!%p2632_p10)
}
  0x60   : > { %s2636_s11 = scalar_lea.vmem %s2947_s14, 2048  ;;  %s2764_s16 = smov [#allocation5]  }
  0x61   : > { %p2637_p3 = scmp.ne.s32.totalorder %s2947_s14, %s2636_s11  ;;  %s2641_s9 = sshll.u32 %s2764_s16, 4  ;;  %s2642_s9 = int_to_ptr.vmem [resolvable:$false] %s2641_s9 }
  0x62   : > { %s2643_s20 = scalar_lea.vmem %s2642_s9, 4096  ;;  %p2644_p13 = scmp.lt.s32.totalorder %s2947_s14, %s2642_s9 }
  0x63   : > { %p2639_p11 = pnand %p2637_p3, %p2597_p7  ;;  %p2645_p1 = scmp.lt.s32.totalorder %s2643_s20, %s2636_s11 }
  0x65   : > { %p2640_p9 = pneg %p2639_p11  ;;  %p2646_p4 = por %p2645_p1, %p2644_p13 }
  0x67   : > { %p2647_p5 = pnand %p2646_p4, %p2640_p9 }
  0x69   : > { %2650 = shalt.err (!%p2647_p5)
}
  0x6a   : > { %s3579_s2 = smov 8   ;;  %s3580_s10 = smov 128  }
  0x6b   : > { %2421 = dma.hbm_to_vmem [thread:$0]  (!%p2914_p2), %s2953_s26, 2048, %s2947_s14, %s263_s0, %s3580_s10, %s3580_s10, %s3579_s2  }
  0x6c   : > { %286 = sbr.rel (%p2846_p8) target bundleno = 1408 (0x580), region = 40  ;;  %s2985_s12 = sand.u32 (!%p2846_p8), 1, %s2749_s22  }
  0x6d   : > { %s2988_s8 = sshll.u32 (!%p2846_p8), %s2985_s12, 3  ;;  %s289_s15 = scalar_lea.sflag (!%p2846_p8), [#allocation3], %s2985_s12 }
  0x6e   : > { %s292_s18 = scalar_lea.vmem (!%p2846_p8), [#allocation2], %s2988_s8  ;;  %p3581_p7 = scmp.ne.s32.totalorder (!%p2846_p8), %s3569_s27, 0 }
  0x71   : > { %2720 = dma.done.wait (%p3581_p7), %s289_s15, 128  }
  0x72   : > { %2722 = vsyncadd (%p3581_p7), %s289_s15, 4294967168  ;;  %s297_s0 = sand.u32 1, %s2827_s25   ;;  %s2181_s29 = sshll.u32 %s2985_s12, 7 }
  0x73   : > { %s298_s14 = scalar_lea.sflag [#allocation6], %s297_s0  ;;  %s2998_s26 = scalar_lea.vmem [#allocation5], %s2181_s29 }
  0x74   : > { %2724 = dma.done.wait (%p3581_p7), %s298_s14, 2048  }
  0x75   : > { %2726 = vsyncadd (%p3581_p7), %s298_s14, 4294965248  ;;  %p3582_p8 = scmp.eq.s32.totalorder %s2827_s25, 0 }
  0x77   : > { %2728 = dma.done.wait (%p3582_p8), [#allocation6], 1024   ;;  %p3583_p2 = pmov %p3582_p8 }
  0x79   : > { %2730 = vsyncadd (%p3583_p2), [#allocation6], 4294966272  ;;  %p3584_p6 = pmov %p3583_p2 }
  0x7a   : > { %p3585_p12 = pmov %p3583_p2 }
  0x7b   : > { %2732 = dma.done.wait (%p3584_p6), [#allocation9], 1024  }
  0x7c   : > { %2734 = vsyncadd (%p3585_p12), [#allocation9], 4294966272  ;;  %v3564_v0 = vmov 0.0   ;;  %vm2766_vm0 = vmmov 0   ;;  %v373_v1 = vld [vmem:[#allocation7 + $0x38] sm:$0xff]  ;;  %v372_v3 = vld [vmem:[#allocation7 + $0x30] sm:$0xff]  ;;  %v654_v36 = vlaneseq }
  0x7d   : > { %2277 = vmatprep.subr.mxu0 %v3564_v0  ;;  %2293 = vmatprep.mubr.msk.f32.mxu0 %vm2766_vm0, %v3564_v0  ;;  %v455_v2 = vld [vmem:[#allocation8 + $0x38] sm:$0xff]  ;;  %v454_v4 = vld [vmem:[#allocation8 + $0x30] sm:$0xff]  ;;  %v371_v5 = vld [vmem:[#allocation7 + $0x28] sm:$0xff]  ;;  %vm374_vm1 = vcmask 523264   ;;  %v2767_v34 = vmov 1966171168  }
  0x7e   : > { %2278 = vmatpush3.msra.mxu0 %v373_v1  ;;  %2296 = vmatprep.subr.mxu1 %v455_v2  ;;  %v453_v6 = vld [vmem:[#allocation8 + $0x28] sm:$0xff]  ;;  %v370_v7 = vld [vmem:[#allocation7 + $0x20] sm:$0xff]  ;;  %v369_v9 = vld [vmem:[#allocation7 + $0x18] sm:$0xff]  ;;  %v652_v35 = vunpack.c.l.s4 %v2767_v34  ;;  %v3105_v38 = vshrl.u32 %v654_v36, 7  ;;  %vm869_vm2 = vcmask 130112   ;;  %vm934_vm3 = vcmask 1041409  }
  0x7f   : > { %2279 = vmatprep.subr.mxu0 %v3564_v0  ;;  %2297 = vmatpush3.msra.mxu1 %v455_v2  ;;  %v452_v8 = vld [vmem:[#allocation8 + $0x20] sm:$0xff]  ;;  %v451_v10 = vld [vmem:[#allocation8 + $0x18] sm:$0xff]  ;;  %v368_v11 = vld [vmem:[#allocation7 + $0x10] sm:$0xff]  ;;  %vm936_vm4 = vcmask 1042434   ;;  %vm938_vm5 = vcmask 1043459   ;;  %vm940_vm6 = vcmask 1044484  }
  0x80   : > { %2280 = vmatpush3.msra.mxu0 %v372_v3  ;;  %2298 = vmatprep.subr.mxu1 %v454_v4  ;;  %v450_v12 = vld [vmem:[#allocation8 + $0x10] sm:$0xff]  ;;  %v367_v13 = vld [vmem:[#allocation7 + $0x8] sm:$0xff]  ;;  %v366_v15 = vld [vmem:[#allocation7] sm:$0xff]  ;;  %v653_v37 = vunpack.c.0.s8 %v652_v35  ;;  %v3109_v42 = vsub.s32 0, %v3105_v38  ;;  %vm942_vm7 = vcmask 1045509   ;;  %vm944_vm8 = vcmask 1046534  }
  0x81   : > { %2281 = vmatprep.subr.mxu0 %v3564_v0  ;;  %2299 = vmatpush3.msra.mxu1 %v454_v4  ;;  %v449_v14 = vld [vmem:[#allocation8 + $0x8] sm:$0xff]  ;;  %v448_v16 = vld [vmem:[#allocation8] sm:$0xff]  ;;  %v349_v17 = vld [vmem:[%s292_s18] sm:$0xff]  ;;  %vm946_vm9 = vcmask 1047559   ;;  %vm949_vm10 = vcmask 130048   ;;  %s347_s13 = scalar_lea.vmem [#allocation11], %s2988_s8 }
  0x82   : > { %2282 = vmatpush3.msra.mxu0 %v371_v5  ;;  %2300 = vmatprep.subr.mxu1 %v453_v6  ;;  %v350_v18 = vld [vmem:[%s2998_s26] sm:$0xff]  ;;  %v351_v19 = vld [vmem:[%s2998_s26 + $0x8] sm:$0xff]  ;;  %v3028_v20 = vld [vmem:[%s2998_s26 + $0x10] sm:$0xff]  ;;  %v656_v39 = vsub.s32 %v653_v37, %v3105_v38  ;;  %s2214_s11 = sshll.u32 %s2827_s25, 7  ;;  %s2024_s2 = sshll.u32 %s347_s13, 4  ;;  %s2025_s2 = int_to_ptr.vmem [resolvable:$true] %s2024_s2 }
  0x83   : > { %2283 = vmatprep.subr.mxu0 %v3564_v0  ;;  %2301 = vmatpush3.msra.mxu1 %v453_v6  ;;  %v3036_v21 = vld [vmem:[%s2998_s26 + $0x18] sm:$0xff]  ;;  %v3040_v22 = vld [vmem:[%s2998_s26 + $0x20] sm:$0xff]  ;;  %v3050_v23 = vld [vmem:[%s2998_s26 + $0x28] sm:$0xff]  ;;  %s2022_s20 = scalar_lea.hbm %s3558_s6, %s2214_s11  ;;  %s1998_s10 = scalar_lea.sflag [#allocation12], %s2985_s12 }
  0x84   : > { %2284 = vmatpush3.msra.mxu0 %v370_v7  ;;  %2302 = vmatprep.subr.mxu1 %v452_v8  ;;  %v3053_v24 = vld [vmem:[%s2998_s26 + $0x30] sm:$0xff]  ;;  %v3060_v25 = vld [vmem:[%s2998_s26 + $0x38] sm:$0xff]  ;;  %v3063_v26 = vld [vmem:[%s2998_s26 + $0x40] sm:$0xff]  ;;  %s2651_s15 = scalar_lea.vmem %s2025_s2, 128  ;;  %p3588_p10 = scmp.ne.s32.totalorder %s3574_s30, 0 }
  0x85   : > { %2285 = vmatprep.subr.mxu0 %v3564_v0  ;;  %2303 = vmatpush3.msra.mxu1 %v452_v8  ;;  %v3070_v27 = vld [vmem:[%s2998_s26 + $0x48] sm:$0xff]  ;;  %v3073_v28 = vld [vmem:[%s2998_s26 + $0x50] sm:$0xff]  ;;  %v3080_v29 = vld [vmem:[%s2998_s26 + $0x58] sm:$0xff]  ;;  %p2652_p0 = scmp.ne.s32.totalorder %s2025_s2, %s2651_s15  ;;  %s2769_s18 = smov [#allocation11]  }
  0x86   : > { %2286 = vmatpush3.msra.mxu0 %v369_v9  ;;  %2304 = vmatprep.subr.mxu1 %v451_v10  ;;  %v3083_v30 = vld [vmem:[%s2998_s26 + $0x60] sm:$0xff]  ;;  %v3090_v31 = vld [vmem:[%s2998_s26 + $0x68] sm:$0xff]  ;;  %v3093_v32 = vld [vmem:[%s2998_s26 + $0x70] sm:$0xff]  ;;  %s2655_s0 = sshll.u32 %s2769_s18, 4  ;;  %s2656_s0 = int_to_ptr.vmem [resolvable:$false] %s2655_s0 }
  0x87   : > { %2287 = vmatprep.subr.mxu0 %v3564_v0  ;;  %2305 = vmatpush3.msra.mxu1 %v451_v10  ;;  %v3100_v33 = vld [vmem:[%s2998_s26 + $0x78] sm:$0xff]  ;;  %p2653_p3 = pnand %p2652_p0, %p3588_p10  ;;  %s2657_s29 = scalar_lea.vmem %s2656_s0, 256 }
  0x88   : > { %2288 = vmatpush3.msra.mxu0 %v368_v11  ;;  %2306 = vmatprep.subr.mxu1 %v450_v12  ;;  %p2658_p9 = scmp.lt.s32.totalorder %s2025_s2, %s2656_s0  ;;  %p2659_p13 = scmp.lt.s32.totalorder %s2657_s29, %s2651_s15 }
  0x89   : > { %2289 = vmatprep.subr.mxu0 %v3564_v0  ;;  %2307 = vmatpush3.msra.mxu1 %v450_v12  ;;  %p2654_p11 = pneg %p2653_p3 }
  0x8a   : > { %2290 = vmatpush3.msra.mxu0 %v367_v13  ;;  %2308 = vmatprep.subr.mxu1 %v449_v14  ;;  %p2660_p1 = por %p2659_p13, %p2658_p9 }
  0x8b   : > { %2291 = vmatprep.subr.mxu0 %v3564_v0  ;;  %2309 = vmatpush3.msra.mxu1 %v449_v14 }
  0x8c   : > { %2292 = vmatpush3.msra.mxu0 %v366_v15  ;;  %2310 = vmatprep.subr.mxu1 %v448_v16  ;;  %p2661_p4 = pnand %p2660_p1, %p2654_p11 }
  0x8d   : > { %2294 = vmatmul.mubr.msk.f32.vlgmr.msra.gmra.mxu0 %vm374_vm1, %v349_v17  ;;  %2311 = vmatpush3.msra.mxu1 %v448_v16  ;;  %v3119_v17 = vld [vmem:[%s3556_s4] ss:$0 sm:$0xff] }
  0x8e   : > { %2312 = vmatprep.mubr.msk.f32.mxu1 %vm374_vm1, %v350_v18  ;;  %2336 = vmatprep.subr.mxu0 %v3564_v0 }
  0x8f   : > { %2313 = vmatmul.mubr.msk.f32.vlgmr.msra.gmra.mxu1 %vm374_vm1, %v351_v19  ;;  %2337 = vmatpush3.msra.mxu0 %v351_v19 }
  0x90   : > { %2315 = vmatprep.mubr.msk.f32.mxu1 %vm374_vm1, %v3028_v20  ;;  %2338 = vmatprep.subr.mxu0 %v3564_v0 }
  0x91   : > { %2339 = vmatpush3.msra.mxu0 %v350_v18  ;;  %2340 = vmatprep.mubr.msk.f32.mxu0 %vm2766_vm0, %v3564_v0 }
  0x92   : > { %2343 = vmatprep.subr.mxu0 %v3564_v0 }
  0x93   : > { %2316 = vmatmul.mubr.msk.f32.gmra.mxu1 %vm374_vm1, %v3036_v21 }
  0x94   : > { %2318 = vmatprep.mubr.msk.f32.mxu1 %vm374_vm1, %v3040_v22 }
  0x97   : > { %2319 = vmatmul.mubr.msk.f32.gmra.mxu1 %vm374_vm1, %v3050_v23 }
  0x98   : > { %2321 = vmatprep.mubr.msk.f32.mxu1 %vm374_vm1, %v3053_v24 }
  0x9b   : > { %2322 = vmatmul.mubr.msk.f32.gmra.mxu1 %vm374_vm1, %v3060_v25 }
  0x9c   : > { %2324 = vmatprep.mubr.msk.f32.mxu1 %vm374_vm1, %v3063_v26 }
  0x9f   : > { %2325 = vmatmul.mubr.msk.f32.gmra.mxu1 %vm374_vm1, %v3070_v27 }
  0xa0   : > { %2327 = vmatprep.mubr.msk.f32.mxu1 %vm374_vm1, %v3073_v28 }
  0xa3   : > { %2328 = vmatmul.mubr.msk.f32.gmra.mxu1 %vm374_vm1, %v3080_v29 }
  0xa4   : > { %2330 = vmatprep.mubr.msk.f32.mxu1 %vm374_vm1, %v3083_v30 }
  0xa7   : > { %2331 = vmatmul.mubr.msk.f32.gmra.mxu1 %vm374_vm1, %v3090_v31 }
  0xa8   : > { %2333 = vmatprep.mubr.msk.f32.mxu1 %vm374_vm1, %v3093_v32 }
  0xab   : > { %2334 = vmatmul.mubr.msk.f32.gmra.mxu1 %vm374_vm1, %v3100_v33 }
 0x14d   : > { %v444_v40 = vpop.f32.mrf.mxu0 }
 0x14e   : > { %v657_v41 = vrot.slane %v444_v40, %v656_v39  ;;  %v650_v51 = vcombine.high %v444_v40, %v444_v40 }
 0x14f   : > { %v2314_v43 = vpop.f32.mrf.mxu1  ;;  %v2295_v44 = vpop.f32.mrf.mxu0 }
 0x150   : > { %v665_v45 = vcombine.high %v657_v41, %v657_v41  ;;  %v673_v46 = vrot.slane %v657_v41, %v656_v39  ;;  %v664_v60 = vrot.slane %v650_v51, %v656_v39 }
 0x151   : > { %v570_v47 = vpop.f32.mrf.mxu1 }
 0x152   : > { %v702_v48 = vrot.slane %v673_v46, %v3109_v42  ;;  %v687_v49 = vrot.slane %v665_v45, %v656_v39  ;;  %v695_v50 = vcombine.high %v673_v46, %v673_v46  ;;  %v666_v3 = vcombine.high %v664_v60, %v664_v60 }
 0x153   : > { %v2317_v52 = vpop.f32.mrf.mxu1  ;;  %v680_v6 = vrot.slane %v664_v60, %v656_v39 }
 0x154   : > { %v740_v53 = vadd.f32 %v2314_v43, %v702_v48  ;;  %v739_v54 = vadd.f32 %v702_v48, %v570_v47  ;;  %v706_v55 = vrot.slane %v687_v49, %v3109_v42  ;;  %v710_v57 = vrot.slane %v695_v50, %v3109_v42 }
 0x155   : > { %v580_v56 = vpop.f32.mrf.mxu1  ;;  %v697_v62 = vcombine.high %v687_v49, %v687_v49  ;;  %v718_v11 = vrot.slane %v680_v6, %v3109_v42  ;;  %v694_v12 = vrot.slane %v666_v3, %v656_v39  ;;  %v696_v16 = vcombine.high %v680_v6, %v680_v6 }
 0x156   : > { %2477 = vtanh.f32 %v740_v53  ;;  %v742_v58 = vadd.f32 %v2317_v52, %v706_v55  ;;  %v741_v59 = vadd.f32 %v706_v55, %v580_v56 }
 0x157   : > { %2479 = vtanh.f32 %v739_v54  ;;  %v2320_v61 = vpop.f32.mrf.mxu1  ;;  %v714_v5 = vrot.slane %v697_v62, %v3109_v42  ;;  %v722_v34 = vrot.slane %v694_v12, %v3109_v42  ;;  %v726_v45 = vrot.slane %v696_v16, %v3109_v42 }
 0x158   : > { %2481 = vtanh.f32 %v742_v58  ;;  %v744_v63 = vadd.f32 %v2320_v61, %v710_v57  ;;  %v698_v49 = vcombine.high %v694_v12, %v694_v12 }
 0x159   : > { %2483 = vtanh.f32 %v741_v59  ;;  %v590_v1 = vpop.f32.mrf.mxu1 }
 0x15a   : > { %v743_v2 = vadd.f32 %v710_v57, %v590_v1  ;;  %v730_v59 = vrot.slane %v698_v49, %v3109_v42 }
 0x15b   : > { %v2323_v4 = vpop.f32.mrf.mxu1 }
 0x15c   : > { %2485 = vtanh.f32 %v743_v2  ;;  %v746_v7 = vadd.f32 %v2323_v4, %v714_v5 }
 0x15d   : > { %2487 = vtanh.f32 %v744_v63  ;;  %v600_v8 = vpop.f32.mrf.mxu1 }
 0x15e   : > { %v745_v9 = vadd.f32 %v714_v5, %v600_v8 }
 0x15f   : > { %v2326_v10 = vpop.f32.mrf.mxu1 }
 0x160   : > { %2489 = vtanh.f32 %v745_v9  ;;  %v748_v13 = vadd.f32 %v2326_v10, %v718_v11 }
 0x161   : > { %2491 = vtanh.f32 %v746_v7  ;;  %v610_v14 = vpop.f32.mrf.mxu1 }
 0x162   : > { %v747_v15 = vadd.f32 %v718_v11, %v610_v14 }
 0x163   : > { %v2478_v18 = vpop.eup %2477  ;;  %v2329_v19 = vpop.f32.mrf.mxu1 }
 0x164   : > { %v2480_v35 = vpop.eup %2479  ;;  %2493 = vtanh.f32 %v747_v15  ;;  %v750_v39 = vadd.f32 %v2329_v19, %v722_v34  ;;  %v779_v50 = vmul.f32 %v2478_v18, %v3119_v17 }
 0x165   : > { %v2482_v37 = vpop.eup %2481  ;;  %2495 = vtanh.f32 %v748_v13  ;;  %v620_v40 = vpop.f32.mrf.mxu1  ;;  %v778_v41 = vmul.f32 %v2480_v35, %v3119_v17 }
 0x166   : > { %v2484_v43 = vpop.eup %2483  ;;  %v749_v44 = vadd.f32 %v722_v34, %v620_v40  ;;  %v781_v55 = vmul.f32 %v2482_v37, %v3119_v17  ;;  %v797_v60 = vsel %vm374_vm1, %v779_v50, 0.0 }
 0x167   : > { %v2332_v46 = vpop.f32.mrf.mxu1  ;;  %v794_v47 = vsel %vm374_vm1, %v778_v41, 0.0  ;;  %v780_v48 = vmul.f32 %v2484_v43, %v3119_v17 }
 0x168   : > { %2497 = vtanh.f32 %v749_v44  ;;  %795 = vadd.xlane.f32.xlu0 %v794_v47  ;;  %v752_v52 = vadd.f32 %v2332_v46, %v726_v45  ;;  %v803_v2 = vsel %vm374_vm1, %v781_v55, 0.0 }
 0x169   : > { %v2486_v51 = vpop.eup %2485  ;;  %2499 = vtanh.f32 %v750_v39  ;;  %v630_v53 = vpop.f32.mrf.mxu1  ;;  %v800_v54 = vsel %vm374_vm1, %v780_v48, 0.0 }
 0x16a   : > { %v2488_v56 = vpop.eup %2487  ;;  %v751_v57 = vadd.f32 %v726_v45, %v630_v53  ;;  %801 = vadd.xlane.f32.xlu1 %v800_v54  ;;  %v782_v61 = vmul.f32 %v2486_v51, %v3119_v17 }
 0x16b   : > { %v2335_v58 = vpop.f32.mrf.mxu1  ;;  %v783_v3 = vmul.f32 %v2488_v56, %v3119_v17 }
 0x16c   : > { %2501 = vtanh.f32 %v751_v57  ;;  %798 = vadd.xlane.f32.xlu0 %v797_v60  ;;  %v754_v63 = vadd.f32 %v2335_v58, %v730_v59  ;;  %v806_v6 = vsel %vm374_vm1, %v782_v61, 0.0  ;;  %v859_v60 = vand.u32 127, %v654_v36 }
 0x16d   : > { %v2490_v62 = vpop.eup %2489  ;;  %2503 = vtanh.f32 %v752_v52  ;;  %v640_v1 = vpop.f32.mrf.mxu1  ;;  %v809_v9 = vsel %vm374_vm1, %v783_v3, 0.0 }
 0x16e   : > { %v2492_v4 = vpop.eup %2491  ;;  %v753_v5 = vadd.f32 %v730_v59, %v640_v1  ;;  %804 = vadd.xlane.f32.xlu1 %v803_v2  ;;  %v784_v7 = vmul.f32 %v2490_v62, %v3119_v17  ;;  %v864_v62 = vadd.s32 4294967288, %v859_v60 }
 0x16f   : > { %v785_v10 = vmul.f32 %v2492_v4, %v3119_v17  ;;  %v3183_v4 = vsub.s32 %v859_v60, %v3105_v38 }
 0x170   : > { %2505 = vtanh.f32 %v753_v5  ;;  %807 = vadd.xlane.f32.xlu0 %v806_v6  ;;  %v812_v12 = vsel %vm374_vm1, %v784_v7, 0.0  ;;  %v3178_v2 = vsub.s32 %v864_v62, %v3105_v38 }
 0x171   : > { %v2494_v8 = vpop.eup %2493  ;;  %2507 = vtanh.f32 %v754_v63  ;;  %v815_v15 = vsel %vm374_vm1, %v785_v10, 0.0 }
 0x172   : > { %v2496_v11 = vpop.eup %2495  ;;  %810 = vadd.xlane.f32.xlu1 %v809_v9  ;;  %v786_v13 = vmul.f32 %v2494_v8, %v3119_v17 }
 0x173   : > { %v787_v16 = vmul.f32 %v2496_v11, %v3119_v17 }
 0x174   : > { %813 = vadd.xlane.f32.xlu0 %v812_v12  ;;  %v818_v19 = vsel %vm374_vm1, %v786_v13, 0.0 }
 0x175   : > { %v2498_v14 = vpop.eup %2497  ;;  %v821_v37 = vsel %vm374_vm1, %v787_v16, 0.0 }
 0x176   : > { %v2500_v18 = vpop.eup %2499  ;;  %816 = vadd.xlane.f32.xlu1 %v815_v15  ;;  %v788_v34 = vmul.f32 %v2498_v14, %v3119_v17 }
 0x177   : > { %v789_v39 = vmul.f32 %v2500_v18, %v3119_v17 }
 0x178   : > { %819 = vadd.xlane.f32.xlu0 %v818_v19  ;;  %v824_v41 = vsel %vm374_vm1, %v788_v34, 0.0 }
 0x179   : > { %v2502_v35 = vpop.eup %2501  ;;  %v827_v45 = vsel %vm374_vm1, %v789_v39, 0.0 }
 0x17a   : > { %v2504_v40 = vpop.eup %2503  ;;  %822 = vadd.xlane.f32.xlu1 %v821_v37  ;;  %v790_v43 = vmul.f32 %v2502_v35, %v3119_v17 }
 0x17b   : > { %v791_v46 = vmul.f32 %v2504_v40, %v3119_v17 }
 0x17c   : > { %825 = vadd.xlane.f32.xlu0 %v824_v41  ;;  %v830_v48 = vsel %vm374_vm1, %v790_v43, 0.0 }
 0x17d   : > { %v2506_v44 = vpop.eup %2505  ;;  %v833_v50 = vsel %vm374_vm1, %v791_v46, 0.0 }
 0x17e   : > { %v2508_v47 = vpop.eup %2507  ;;  %828 = vadd.xlane.f32.xlu1 %v827_v45  ;;  %v792_v49 = vmul.f32 %v2506_v44, %v3119_v17 }
 0x17f   : > { %v793_v51 = vmul.f32 %v2508_v47, %v3119_v17 }
 0x180   : > { %831 = vadd.xlane.f32.xlu0 %v830_v48  ;;  %v836_v52 = vsel %vm374_vm1, %v792_v49, 0.0 }
 0x181   : > { %v839_v53 = vsel %vm374_vm1, %v793_v51, 0.0 }
 0x182   : > { %834 = vadd.xlane.f32.xlu1 %v833_v50 }
 0x184   : > { %837 = vadd.xlane.f32.xlu0 %v836_v52 }
 0x186   : > { %840 = vadd.xlane.f32.xlu1 %v839_v53 }
 0x1f1   : > { %v3156_v54 = vpop.xlane.xlu0 %795 }
 0x1f2   : > { %v863_v13 = vrot.slane %v3156_v54, %v3183_v4 }
 0x1f3   : > { %v3158_v55 = vpop.xlane.xlu1 %801 }
 0x1f4   : > { %v874_v7 = vrot.slane %v3158_v55, %v3183_v4 }
 0x1f5   : > { %v3160_v56 = vpop.xlane.xlu0 %798 }
 0x1f6   : > { %v868_v8 = vrot.slane %v3160_v56, %v3178_v2 }
 0x1f7   : > { %v3162_v57 = vpop.xlane.xlu1 %804 }
 0x1f8   : > { %v878_v5 = vrot.slane %v3162_v57, %v3178_v2  ;;  %v870_v35 = vsel %vm869_vm2, %v868_v8, %v863_v13  ;;  %v2768_v8 = vmov 0  }
 0x1f9   : > { %v3164_v58 = vpop.xlane.xlu0 %807  ;;  %2476 = vset.pattern.permute.xlu0 %v2768_v8  ;;  %2475 = vset.pattern.permute.xlu1 %v2768_v8 }
 0x1fa   : > { %v883_v10 = vrot.slane %v3164_v58, %v3183_v4  ;;  %v879_v14 = vsel %vm869_vm2, %v878_v5, %v874_v7 }
 0x1fb   : > { %v3166_v59 = vpop.xlane.xlu1 %810  ;;  %v935_v41 = vsel %vm934_vm3, %v879_v14, %v870_v35  ;;  %v976_v14 = vsub.s32 5, %v3105_v38  ;;  %v3566_v35 = vsub.s32 6, %v3105_v38 }
 0x1fc   : > { %v887_v36 = vrot.slane %v3166_v59, %v3178_v2 }
 0x1fd   : > { %v3168_v17 = vpop.xlane.xlu0 %813 }
 0x1fe   : > { %v892_v15 = vrot.slane %v3168_v17, %v3183_v4  ;;  %v888_v18 = vsel %vm869_vm2, %v887_v36, %v883_v10 }
 0x1ff   : > { %v3171_v61 = vpop.xlane.xlu1 %816  ;;  %v937_v46 = vsel %vm936_vm4, %v888_v18, %v935_v41  ;;  %v964_v18 = vsub.s32 2, %v3105_v38 }
 0x200   : > { %v896_v9 = vrot.slane %v3171_v61, %v3178_v2 }
 0x201   : > { %v3173_v63 = vpop.xlane.xlu0 %819 }
 0x202   : > { %v901_v19 = vrot.slane %v3173_v63, %v3183_v4  ;;  %v897_v37 = vsel %vm869_vm2, %v896_v9, %v892_v15  ;;  %v960_v9 = vsub.s32 1, %v3105_v38 }
 0x203   : > { %v3175_v1 = vpop.xlane.xlu1 %822  ;;  %v939_v48 = vsel %vm938_vm5, %v897_v37, %v937_v46  ;;  %v968_v46 = vsub.s32 3, %v3105_v38 }
 0x204   : > { %v905_v11 = vrot.slane %v3175_v1, %v3178_v2 }
 0x205   : > { %v3180_v3 = vpop.xlane.xlu0 %825 }
 0x206   : > { %v910_v39 = vrot.slane %v3180_v3, %v3183_v4  ;;  %v906_v43 = vsel %vm869_vm2, %v905_v11, %v901_v19 }
 0x207   : > { %v3189_v6 = vpop.xlane.xlu1 %828  ;;  %v941_v53 = vsel %vm940_vm6, %v906_v43, %v939_v48 }
 0x208   : > { %v914_v16 = vrot.slane %v3189_v6, %v3178_v2 }
 0x209   : > { %v3201_v12 = vpop.xlane.xlu0 %831 }
 0x20a   : > { %v919_v44 = vrot.slane %v3201_v12, %v3183_v4  ;;  %v915_v47 = vsel %vm869_vm2, %v914_v16, %v910_v39 }
 0x20b   : > { %v3213_v34 = vpop.xlane.xlu1 %834  ;;  %v943_v60 = vsel %vm942_vm7, %v915_v47, %v941_v53 }
 0x20c   : > { %v923_v40 = vrot.slane %v3213_v34, %v3178_v2 }
 0x20d   : > { %v3225_v45 = vpop.xlane.xlu0 %837 }
 0x20e   : > { %v924_v50 = vsel %vm869_vm2, %v923_v40, %v919_v44  ;;  %v928_v51 = vrot.slane %v3225_v45, %v3183_v4 }
 0x20f   : > { %v3230_v49 = vpop.xlane.xlu1 %840  ;;  %v945_v5 = vsel %vm944_vm8, %v924_v50, %v943_v60 }
 0x210   : > { %v932_v52 = vrot.slane %v3230_v49, %v3178_v2 }
 0x212   : > { %v933_v62 = vsel %vm869_vm2, %v932_v52, %v928_v51 }
 0x213   : > { %v947_v36 = vsel %vm946_vm9, %v933_v62, %v945_v5 }
 0x214   : > { %v950_v7 = vsel %vm949_vm10, %v947_v36, -inf }
 0x215   : > { %951 = vmax.xlane.f32.xlu0 %v950_v7 }
 0x29e   : > { %v952_v10 = vpop.xlane.xlu0 %951 }
 0x29f   : > { %v957_v11 = vrot.slane %v952_v10, %v3109_v42  ;;  %v961_v13 = vrot.slane %v952_v10, %v960_v9  ;;  %v3255_v37 = vrot.slane %v952_v10, %v976_v14  ;;  %v965_v41 = vrot.slane %v952_v10, %v964_v18 }
 0x2a0   : > { %v969_v52 = vrot.slane %v952_v10, %v968_v46 }
 0x2a1   : > { %v994_v15 = vsub.f32 %v3156_v54, %v957_v11  ;;  %v995_v16 = vsub.f32 %v3160_v56, %v957_v11  ;;  %v996_v19 = vsub.f32 %v3158_v55, %v961_v13  ;;  %v997_v43 = vsub.f32 %v3162_v57, %v961_v13 }
 0x2a2   : > { %v984_v56 = vsub.s32 7, %v3105_v38  ;;  %v981_v55 = vrot.slane %v952_v10, %v3566_v35  ;;  %v1004_v44 = vsub.f32 %v3180_v3, %v3255_v37  ;;  %v998_v47 = vsub.f32 %v3164_v58, %v965_v41 }
 0x2a3   : > { %v1010_v39 = vmul.f32 1.442695, %v994_v15  ;;  %v1012_v40 = vmul.f32 1.442695, %v995_v16  ;;  %v1014_v54 = vmul.f32 1.442695, %v996_v19  ;;  %v999_v53 = vsub.f32 %v3166_v59, %v965_v41 }
 0x2a4   : > { %v1016_v48 = vmul.f32 1.442695, %v997_v43  ;;  %v985_v57 = vrot.slane %v952_v10, %v984_v56  ;;  %v1006_v50 = vsub.f32 %v3201_v12, %v981_v55  ;;  %v1030_v51 = vmul.f32 1.442695, %v1004_v44 }
 0x2a5   : > { %2509 = vpow2.f32 %v1010_v39  ;;  %v1018_v60 = vmul.f32 1.442695, %v998_v47  ;;  %v972_v58 = vsub.s32 4, %v3105_v38  ;;  %v1000_v5 = vsub.f32 %v3168_v17, %v969_v52 }
 0x2a6   : > { %2511 = vpow2.f32 %v1012_v40  ;;  %v1008_v3 = vsub.f32 %v3225_v45, %v985_v57  ;;  %v1034_v62 = vmul.f32 1.442695, %v1006_v50  ;;  %v1020_v36 = vmul.f32 1.442695, %v999_v53 }
 0x2a7   : > { %2513 = vpow2.f32 %v1014_v54  ;;  %v973_v59 = vrot.slane %v952_v10, %v972_v58  ;;  %v1001_v45 = vsub.f32 %v3171_v61, %v969_v52  ;;  %v1022_v11 = vmul.f32 1.442695, %v1000_v5 }
 0x2a8   : > { %2515 = vpow2.f32 %v1016_v48  ;;  %v1038_v8 = vmul.f32 1.442695, %v1008_v3  ;;  %v1007_v54 = vsub.f32 %v3213_v34, %v981_v55 }
 0x2a9   : > { %2517 = vpow2.f32 %v1030_v51  ;;  %v1002_v13 = vsub.f32 %v3173_v63, %v973_v59  ;;  %v1024_v15 = vmul.f32 1.442695, %v1001_v45  ;;  %v1003_v10 = vsub.f32 %v3175_v1, %v973_v59 }
 0x2aa   : > { %2519 = vpow2.f32 %v1018_v60  ;;  %v1005_v63 = vsub.f32 %v3189_v6, %v3255_v37  ;;  %v1009_v6 = vsub.f32 %v3230_v49, %v985_v57  ;;  %v1036_v37 = vmul.f32 1.442695, %v1007_v54 }
 0x2ab   : > { %2521 = vpow2.f32 %v1034_v62  ;;  %v1026_v61 = vmul.f32 1.442695, %v1002_v13  ;;  %v1028_v41 = vmul.f32 1.442695, %v1003_v10 }
 0x2ac   : > { %2523 = vpow2.f32 %v1020_v36  ;;  %v1032_v44 = vmul.f32 1.442695, %v1005_v63  ;;  %v1040_v50 = vmul.f32 1.442695, %v1009_v6 }
 0x2ad   : > { %2525 = vpow2.f32 %v1038_v8 }
 0x2ae   : > { %2527 = vpow2.f32 %v1022_v11 }
 0x2af   : > { %2529 = vpow2.f32 %v1024_v15 }
 0x2b0   : > { %2531 = vpow2.f32 %v1026_v61 }
 0x2b1   : > { %2533 = vpow2.f32 %v1028_v41 }
 0x2b2   : > { %v3276_v7 = vpop.eup %2509  ;;  %2535 = vpow2.f32 %v1032_v44 }
 0x2b3   : > { %v3278_v12 = vpop.eup %2511  ;;  %1059 = vperm.xlu1 %2475, %v3276_v7   ;;  %2537 = vpow2.f32 %v1036_v37 }
 0x2b4   : > { %1062 = vperm.xlu0 %2476, %v3278_v12   ;;  %v3285_v17 = vpop.eup %2513  ;;  %2539 = vpow2.f32 %v1040_v50 }
 0x2b5   : > { %v3289_v16 = vpop.eup %2515 }
 0x2b6   : > { %v3292_v19 = vpop.eup %2517 }
 0x2b7   : > { %1065 = vperm.xlu1 %2475, %v3285_v17   ;;  %v3296_v39 = vpop.eup %2519 }
 0x2b8   : > { %1089 = vperm.xlu0 %2476, %v3292_v19   ;;  %v3299_v40 = vpop.eup %2521 }
 0x2b9   : > { %v3304_v43 = vpop.eup %2523 }
 0x2ba   : > { %v3307_v1 = vpop.eup %2525 }
 0x2bb   : > { %1068 = vperm.xlu1 %2475, %v3289_v16   ;;  %v3311_v47 = vpop.eup %2527 }
 0x2bc   : > { %1095 = vperm.xlu0 %2476, %v3299_v40   ;;  %v3315_v48 = vpop.eup %2529 }
 0x2bd   : > { %v3318_v51 = vpop.eup %2531 }
 0x2be   : > { %v3321_v34 = vpop.eup %2533 }
 0x2bf   : > { %1071 = vperm.xlu1 %2475, %v3296_v39   ;;  %v3324_v55 = vpop.eup %2535 }
 0x2c0   : > { %1101 = vperm.xlu0 %2476, %v3307_v1   ;;  %v3327_v49 = vpop.eup %2537 }
 0x2c1   : > { %v3330_v57 = vpop.eup %2539 }
 0x2c3   : > { %1074 = vperm.xlu1 %2475, %v3304_v43  }
 0x2c7   : > { %1077 = vperm.xlu1 %2475, %v3311_v47  }
 0x2cb   : > { %1080 = vperm.xlu1 %2475, %v3315_v48  }
 0x2cf   : > { %1083 = vperm.xlu1 %2475, %v3318_v51  }
 0x2d3   : > { %1086 = vperm.xlu1 %2475, %v3321_v34  }
 0x2d7   : > { %1092 = vperm.xlu1 %2475, %v3324_v55  }
 0x2db   : > { %1098 = vperm.xlu1 %2475, %v3327_v49  }
 0x2df   : > { %1104 = vperm.xlu1 %2475, %v3330_v57  }
 0x32e   : > { %v1060_v52 = vpop.permute.xlu1 %1059 }
 0x32f   : > { %v1063_v36 = vpop.permute.xlu0 %1062  ;;  %v1109_v41 = vrot.slane %v1060_v52, %v3183_v4 }
 0x330   : > { %v1113_v63 = vrot.slane %v1063_v36, %v3178_v2 }
 0x332   : > { %v1066_v53 = vpop.permute.xlu1 %1065  ;;  %v1114_v52 = vsel %vm869_vm2, %v1113_v63, %v1109_v41 }
 0x333   : > { %v1090_v45 = vpop.permute.xlu0 %1089  ;;  %v1118_v54 = vrot.slane %v1066_v53, %v3183_v4 }
 0x334   : > { %v1154_v53 = vrot.slane %v1090_v45, %v3183_v4 }
 0x336   : > { %v1069_v60 = vpop.permute.xlu1 %1068 }
 0x337   : > { %v1122_v13 = vrot.slane %v1069_v60, %v3178_v2  ;;  %v1096_v15 = vpop.permute.xlu0 %1095 }
 0x339   : > { %v1123_v50 = vsel %vm869_vm2, %v1122_v13, %v1118_v54 }
 0x33a   : > { %v1072_v3 = vpop.permute.xlu1 %1071  ;;  %v1178_v13 = vsel %vm934_vm3, %v1123_v50, %v1114_v52 }
 0x33b   : > { %v1127_v6 = vrot.slane %v1072_v3, %v3183_v4 }
 0x33e   : > { %v1075_v62 = vpop.permute.xlu1 %1074 }
 0x33f   : > { %v1131_v10 = vrot.slane %v1075_v62, %v3178_v2 }
 0x341   : > { %v1132_v62 = vsel %vm869_vm2, %v1131_v10, %v1127_v6 }
 0x342   : > { %v1078_v5 = vpop.permute.xlu1 %1077  ;;  %v1179_v10 = vsel %vm936_vm4, %v1132_v62, %v1178_v13 }
 0x343   : > { %v1136_v60 = vrot.slane %v1078_v5, %v3183_v4  ;;  %v1102_v5 = vpop.permute.xlu0 %1101 }
 0x344   : > { %v1172_v41 = vrot.slane %v1102_v5, %v3183_v4 }
 0x346   : > { %v1081_v8 = vpop.permute.xlu1 %1080 }
 0x347   : > { %v1140_v44 = vrot.slane %v1081_v8, %v3178_v2 }
 0x349   : > { %v1141_v8 = vsel %vm869_vm2, %v1140_v44, %v1136_v60 }
 0x34a   : > { %v1084_v59 = vpop.permute.xlu1 %1083  ;;  %v1180_v54 = vsel %vm938_vm5, %v1141_v8, %v1179_v10 }
 0x34b   : > { %v1145_v36 = vrot.slane %v1084_v59, %v3183_v4 }
 0x34e   : > { %v1087_v11 = vpop.permute.xlu1 %1086 }
 0x34f   : > { %v1149_v37 = vrot.slane %v1087_v11, %v3178_v2  ;;  %v1163_v11 = vrot.slane %v1096_v15, %v3183_v4 }
 0x352   : > { %v1093_v61 = vpop.permute.xlu1 %1092 }
 0x353   : > { %v1158_v0 = vrot.slane %v1093_v61, %v3178_v2  ;;  %v1150_v61 = vsel %vm869_vm2, %v1149_v37, %v1145_v36 }
 0x355   : > { %v1159_v59 = vsel %vm869_vm2, %v1158_v0, %v1154_v53 }
 0x356   : > { %v1099_v35 = vpop.permute.xlu1 %1098 }
 0x357   : > { %v1167_v3 = vrot.slane %v1099_v35, %v3178_v2  ;;  %v1181_v35 = vsel %vm940_vm6, %v1150_v61, %v1180_v54 }
 0x358   : > { %v1182_v44 = vsel %vm942_vm7, %v1159_v59, %v1181_v35 }
 0x359   : > { %v1168_v63 = vsel %vm869_vm2, %v1167_v3, %v1163_v11 }
 0x35a   : > { %v1105_v45 = vpop.permute.xlu1 %1104  ;;  %v1183_v37 = vsel %vm944_vm8, %v1168_v63, %v1182_v44 }
 0x35b   : > { %v1176_v15 = vrot.slane %v1105_v45, %v3178_v2 }
 0x35d   : > { %v1177_v6 = vsel %vm869_vm2, %v1176_v15, %v1172_v41 }
 0x35e   : > { %v1184_v50 = vsel %vm946_vm9, %v1177_v6, %v1183_v37 }
 0x35f   : > { %v1186_v0 = vsel %vm949_vm10, %v1184_v50, 0.0 }
 0x360   : > { %1187 = vadd.xlane.f32.xlu0 %v1186_v0 }
 0x3e9   : > { %v1188_v60 = vpop.xlane.xlu0 %1187 }
 0x3ea   : > { %2541 = vrcp.f32 %v1188_v60 }
 0x3f7   : > { %v2542_v62 = vpop.eup %2541 }
 0x3f8   : > { %v1210_v36 = vrot.slane %v2542_v62, %v972_v58  ;;  %v1194_v52 = vrot.slane %v2542_v62, %v3109_v42  ;;  %v1222_v3 = vrot.slane %v2542_v62, %v984_v56  ;;  %v1198_v5 = vrot.slane %v2542_v62, %v960_v9 }
 0x3fa   : > { %v1239_v53 = vmul.f32 %v3318_v51, %v1210_v36  ;;  %v1231_v8 = vmul.f32 %v3276_v7, %v1194_v52  ;;  %v1245_v11 = vmul.f32 %v3307_v1, %v1222_v3  ;;  %v1232_v13 = vmul.f32 %v3278_v12, %v1194_v52 }
 0x3fb   : > { %v1233_v42 = vmul.f32 %v3285_v17, %v1198_v5  ;;  %v1234_v58 = vmul.f32 %v3289_v16, %v1198_v5  ;;  %v1202_v7 = vrot.slane %v2542_v62, %v964_v18  ;;  %v1206_v12 = vrot.slane %v2542_v62, %v968_v46 }
 0x3fc   : > { %1606 = vperm.xlu0 %2476, %v1239_v53   ;;  %1250 = vperm.xlu1 %2475, %v1231_v8   ;;  %v1240_v16 = vmul.f32 %v3321_v34, %v1210_v36  ;;  %v1214_v18 = vrot.slane %v2542_v62, %v976_v14  ;;  %v3586_v46 = vsub.s32 6, %v3105_v38  ;;  %v1246_v34 = vmul.f32 %v3330_v57, %v1222_v3 }
 0x3fd   : > { %v1235_v56 = vmul.f32 %v3296_v39, %v1202_v7  ;;  %v1236_v1 = vmul.f32 %v3304_v43, %v1202_v7  ;;  %v1237_v9 = vmul.f32 %v3311_v47, %v1206_v12  ;;  %v1238_v17 = vmul.f32 %v3315_v48, %v1206_v12 }
 0x3fe   : > { %v1241_v39 = vmul.f32 %v3292_v19, %v1214_v18  ;;  %v1242_v43 = vmul.f32 %v3324_v55, %v1214_v18  ;;  %v1218_v51 = vrot.slane %v2542_v62, %v3586_v46 }
 0x400   : > { %1873 = vperm.xlu0 %2476, %v1245_v11   ;;  %1253 = vperm.xlu1 %2475, %v1232_v13   ;;  %v1243_v47 = vmul.f32 %v3299_v40, %v1218_v51  ;;  %v1244_v48 = vmul.f32 %v3327_v49, %v1218_v51  ;;  %v3587_v40 = vmov 0.0  }
 0x404   : > { %1339 = vperm.xlu1 %2475, %v1233_v42  }
 0x408   : > { %1342 = vperm.xlu1 %2475, %v1234_v58  }
 0x40c   : > { %1428 = vperm.xlu1 %2475, %v1235_v56  }
 0x410   : > { %1431 = vperm.xlu1 %2475, %v1236_v1  }
 0x414   : > { %1517 = vperm.xlu1 %2475, %v1237_v9  }
 0x418   : > { %1520 = vperm.xlu1 %2475, %v1238_v17  }
 0x41c   : > { %1609 = vperm.xlu1 %2475, %v1240_v16  }
 0x420   : > { %1695 = vperm.xlu1 %2475, %v1241_v39  }
 0x424   : > { %1698 = vperm.xlu1 %2475, %v1242_v43  }
 0x428   : > { %1784 = vperm.xlu1 %2475, %v1243_v47  }
 0x42c   : > { %1787 = vperm.xlu1 %2475, %v1244_v48  }
 0x430   : > { %1876 = vperm.xlu1 %2475, %v1246_v34  }
 0x477   : > { %v1251_v14 = vpop.permute.xlu1 %1250  ;;  %v1607_v44 = vpop.permute.xlu0 %1606 }
 0x478   : > { %v1258_v19 = vrot.slane %v1251_v14, %v3183_v4  ;;  %v1614_v37 = vrot.slane %v1607_v44, %v3183_v4 }
 0x47b   : > { %v1254_v61 = vpop.permute.xlu1 %1253  ;;  %v1874_v53 = vpop.permute.xlu0 %1873 }
 0x47c   : > { %v1262_v10 = vrot.slane %v1254_v61, %v3178_v2  ;;  %v1881_v13 = vrot.slane %v1874_v53, %v3183_v4 }
 0x47e   : > { %v3399_v55 = vsel %vm869_vm2, %v1262_v10, %v1258_v19 }
 0x47f   : > { %2341 = vmatmul.mubr.msk.f32.vlgmr.msra.gmra.mxu0 %vm949_vm10, %v3399_v55  ;;  %v1340_v38 = vpop.permute.xlu1 %1339 }
 0x480   : > { %2344 = vmatpush3.msra.mxu0 %v3036_v21  ;;  %2347 = vmatprep.mubr.msk.f32.mxu0 %vm2766_vm0, %v3587_v40  ;;  %v1347_v57 = vrot.slane %v1340_v38, %v3183_v4 }
 0x481   : > { %2345 = vmatprep.subr.mxu0 %v3587_v40 }
 0x482   : > { %2346 = vmatpush3.msra.mxu0 %v3028_v20 }
 0x483   : > { %v1343_v49 = vpop.permute.xlu1 %1342  ;;  %2350 = vmatprep.subr.mxu0 %v3587_v40 }
 0x484   : > { %v1351_v59 = vrot.slane %v1343_v49, %v3178_v2 }
 0x486   : > { %v1352_v54 = vsel %vm869_vm2, %v1351_v59, %v1347_v57 }
 0x487   : > { %2348 = vmatmul.mubr.msk.f32.vlgmr.msra.gmra.mxu0 %vm949_vm10, %v1352_v54  ;;  %v1429_v63 = vpop.permute.xlu1 %1428  ;;  %v1983_v8 = vsel %vm934_vm3, %v1352_v54, %v3399_v55 }
 0x488   : > { %2351 = vmatpush3.msra.mxu0 %v3050_v23  ;;  %2354 = vmatprep.mubr.msk.f32.mxu0 %vm2766_vm0, %v3587_v40  ;;  %v1436_v21 = vrot.slane %v1429_v63, %v3183_v4 }
 0x489   : > { %2352 = vmatprep.subr.mxu0 %v3587_v40 }
 0x48a   : > { %2353 = vmatpush3.msra.mxu0 %v3040_v22 }
 0x48b   : > { %v1432_v20 = vpop.permute.xlu1 %1431  ;;  %2357 = vmatprep.subr.mxu0 %v3587_v40 }
 0x48c   : > { %v1440_v45 = vrot.slane %v1432_v20, %v3178_v2 }
 0x48e   : > { %v1441_v41 = vsel %vm869_vm2, %v1440_v45, %v1436_v21 }
 0x48f   : > { %2355 = vmatmul.mubr.msk.f32.vlgmr.msra.gmra.mxu0 %vm949_vm10, %v1441_v41  ;;  %v1518_v35 = vpop.permute.xlu1 %1517 }
 0x490   : > { %2358 = vmatpush3.msra.mxu0 %v3060_v25  ;;  %2361 = vmatprep.mubr.msk.f32.mxu0 %vm2766_vm0, %v3587_v40  ;;  %v1525_v23 = vrot.slane %v1518_v35, %v3183_v4 }
 0x491   : > { %2359 = vmatprep.subr.mxu0 %v3587_v40 }
 0x492   : > { %2360 = vmatpush3.msra.mxu0 %v3053_v24 }
 0x493   : > { %v1521_v22 = vpop.permute.xlu1 %1520  ;;  %2364 = vmatprep.subr.mxu0 %v3587_v40 }
 0x494   : > { %v1529_v15 = vrot.slane %v1521_v22, %v3178_v2 }
 0x496   : > { %v1530_v6 = vsel %vm869_vm2, %v1529_v15, %v1525_v23 }
 0x497   : > { %2362 = vmatmul.mubr.msk.f32.vlgmr.msra.gmra.mxu0 %vm949_vm10, %v1530_v6  ;;  %v1610_v25 = vpop.permute.xlu1 %1609 }
 0x498   : > { %v1618_v50 = vrot.slane %v1610_v25, %v3178_v2  ;;  %2365 = vmatpush3.msra.mxu0 %v3070_v27  ;;  %2368 = vmatprep.mubr.msk.f32.mxu0 %vm2766_vm0, %v3587_v40 }
 0x499   : > { %2366 = vmatprep.subr.mxu0 %v3587_v40 }
 0x49a   : > { %v1619_v24 = vsel %vm869_vm2, %v1618_v50, %v1614_v37  ;;  %2367 = vmatpush3.msra.mxu0 %v3063_v26 }
 0x49b   : > { %2369 = vmatmul.mubr.msk.f32.vlgmr.msra.gmra.mxu0 %vm949_vm10, %v1619_v24  ;;  %v1696_v0 = vpop.permute.xlu1 %1695  ;;  %2371 = vmatprep.subr.mxu0 %v3587_v40 }
 0x49c   : > { %2372 = vmatpush3.msra.mxu0 %v3080_v29  ;;  %2375 = vmatprep.mubr.msk.f32.mxu0 %vm2766_vm0, %v3587_v40  ;;  %v1703_v60 = vrot.slane %v1696_v0, %v3183_v4 }
 0x49d   : > { %2373 = vmatprep.subr.mxu0 %v3587_v40 }
 0x49e   : > { %2374 = vmatpush3.msra.mxu0 %v3073_v28 }
 0x49f   : > { %v1699_v27 = vpop.permute.xlu1 %1698  ;;  %2378 = vmatprep.subr.mxu0 %v3587_v40 }
 0x4a0   : > { %v1707_v26 = vrot.slane %v1699_v27, %v3178_v2 }
 0x4a2   : > { %v1708_v62 = vsel %vm869_vm2, %v1707_v26, %v1703_v60 }
 0x4a3   : > { %2376 = vmatmul.mubr.msk.f32.vlgmr.msra.gmra.mxu0 %vm949_vm10, %v1708_v62  ;;  %v1785_v36 = vpop.permute.xlu1 %1784 }
 0x4a4   : > { %2379 = vmatpush3.msra.mxu0 %v3090_v31  ;;  %2382 = vmatprep.mubr.msk.f32.mxu0 %vm2766_vm0, %v3587_v40  ;;  %v1792_v29 = vrot.slane %v1785_v36, %v3183_v4  ;;  %v1984_v31 = vsel %vm936_vm4, %v1441_v41, %v1983_v8 }
 0x4a5   : > { %2380 = vmatprep.subr.mxu0 %v3587_v40  ;;  %v1985_v11 = vsel %vm938_vm5, %v1530_v6, %v1984_v31 }
 0x4a6   : > { %2381 = vmatpush3.msra.mxu0 %v3083_v30  ;;  %v1986_v5 = vsel %vm940_vm6, %v1619_v24, %v1985_v11 }
 0x4a7   : > { %v1788_v28 = vpop.permute.xlu1 %1787  ;;  %2385 = vmatprep.subr.mxu0 %v3587_v40  ;;  %v1987_v58 = vsel %vm942_vm7, %v1708_v62, %v1986_v5 }
 0x4a8   : > { %v1796_v52 = vrot.slane %v1788_v28, %v3178_v2 }
 0x4aa   : > { %v1797_v3 = vsel %vm869_vm2, %v1796_v52, %v1792_v29 }
 0x4ab   : > { %2383 = vmatmul.mubr.msk.f32.vlgmr.msra.gmra.mxu0 %vm949_vm10, %v1797_v3  ;;  %v1877_v30 = vpop.permute.xlu1 %1876  ;;  %v1988_v7 = vsel %vm944_vm8, %v1797_v3, %v1987_v58 }
 0x4ac   : > { %2386 = vmatpush3.msra.mxu0 %v3100_v33  ;;  %v1885_v42 = vrot.slane %v1877_v30, %v3178_v2  ;;  %2389 = vmatprep.mubr.msk.f32.mxu0 %vm2766_vm0, %v3587_v40 }
 0x4ad   : > { %2387 = vmatprep.subr.mxu0 %v3587_v40 }
 0x4ae   : > { %v1886_v56 = vsel %vm869_vm2, %v1885_v42, %v1881_v13  ;;  %2388 = vmatpush3.msra.mxu0 %v3093_v32 }
 0x4af   : > { %v1989_v4 = vsel %vm946_vm9, %v1886_v56, %v1988_v7  ;;  %2390 = vmatmul.mubr.msk.f32.vlgmr.msra.gmra.mxu0 %vm949_vm10, %v1886_v56 }
 0x4b0   : > { %1991 = vst.msk [vmem:[%s347_s13] sm:$0xff] %vm949_vm10, %v1989_v4 }
 0x4b1   : > { %2664 = shalt.err (!%p2661_p4)
}
 0x4b2   : > { %s2665_s14 = scalar_lea.hbm %s2022_s20, 128  ;;  %s2669_s17 = scalar_lea.hbm %s3558_s6, 256 }
 0x4b3   : > { %p2666_p5 = scmp.ne.s32.totalorder %s2022_s20, %s2665_s14  ;;  %p2670_p2 = scmp.lt.s32.totalorder %s2022_s20, %s3558_s6 }
 0x4b4   : > { %p2671_p6 = scmp.lt.s32.totalorder %s2669_s17, %s2665_s14 }
 0x4b5   : > { %p2667_p7 = pnand %p2666_p5, %p3588_p10 }
 0x4b6   : > { %p2672_p12 = por %p2671_p6, %p2670_p2 }
 0x4b7   : > { %p2668_p8 = pneg %p2667_p7 }
 0x4b9   : > { %p2673_p0 = pnand %p2672_p12, %p2668_p8 }
 0x4bb   : > { %2676 = shalt.err (!%p2673_p0)
}
 0x4bc   : > { %2405 = dma.vmem_to_hbm [thread:$0]  (%p3588_p10), %s2025_s2, 128, %s2022_s20, %s1998_s10  }
 0x4bd   : > { %s340_s9 = scalar_lea.vmem [#allocation10], %s2988_s8  ;;  %s3513_s15 = scalar_lea.hbm %s3557_s5, %s2214_s11 }
 0x4be   : > { %s2011_s20 = sshll.u32 %s340_s9, 4  ;;  %s1993_s8 = scalar_lea.sflag [#allocation4], %s2985_s12  ;;  %s2012_s20 = int_to_ptr.vmem [resolvable:$true] %s2011_s20 }
 0x4bf   : > { %s2677_s18 = scalar_lea.vmem %s2012_s20, 128  ;;  %s2770_s0 = smov [#allocation10]  }
 0x4c0   : > { %p2678_p3 = scmp.ne.s32.totalorder %s2012_s20, %s2677_s18  ;;  %s2681_s29 = sshll.u32 %s2770_s0, 4  ;;  %s2682_s29 = int_to_ptr.vmem [resolvable:$false] %s2681_s29 }
 0x4c1   : > { %s2683_s25 = scalar_lea.vmem %s2682_s29, 256  ;;  %p2684_p13 = scmp.lt.s32.totalorder %s2012_s20, %s2682_s29 }
 0x4c2   : > { %p2679_p11 = pnand %p2678_p3, %p3588_p10  ;;  %p2685_p1 = scmp.lt.s32.totalorder %s2683_s25, %s2677_s18 }
 0x4c4   : > { %p2680_p9 = pneg %p2679_p11  ;;  %p2686_p4 = por %p2685_p1, %p2684_p13 }
 0x4c6   : > { %p2687_p5 = pnand %p2686_p4, %p2680_p9 }
 0x53f   : > { %v1332_v32 = vpop.f32.mrf.mxu0 }
 0x541   : > { %v2342_v33 = vpop.f32.mrf.mxu0 }
 0x547   : > { %v1421_v2 = vpop.f32.mrf.mxu0 }
 0x548   : > { %v1967_v51 = vrot.slane %v1421_v2, 7 }
 0x549   : > { %v2349_v1 = vpop.f32.mrf.mxu0 }
 0x54a   : > { %v1968_v61 = vsel %vm934_vm3, %v1967_v51, %v1332_v32 }
 0x54f   : > { %v1510_v12 = vpop.f32.mrf.mxu0 }
 0x550   : > { %v1969_v47 = vrot.slane %v1510_v12, 6 }
 0x551   : > { %v2356_v9 = vpop.f32.mrf.mxu0 }
 0x552   : > { %v1970_v10 = vsel %vm936_vm4, %v1969_v47, %v1968_v61 }
 0x557   : > { %v1599_v17 = vpop.f32.mrf.mxu0 }
 0x558   : > { %v1971_v48 = vrot.slane %v1599_v17, 5 }
 0x559   : > { %v2363_v16 = vpop.f32.mrf.mxu0 }
 0x55a   : > { %v1972_v40 = vsel %vm938_vm5, %v1971_v48, %v1970_v10 }
 0x55b   : > { %v1688_v18 = vpop.f32.mrf.mxu0 }
 0x55c   : > { %v1973_v34 = vrot.slane %v1688_v18, 4 }
 0x55d   : > { %v2370_v39 = vpop.f32.mrf.mxu0 }
 0x55e   : > { %v1974_v49 = vsel %vm940_vm6, %v1973_v34, %v1972_v40 }
 0x563   : > { %v1777_v43 = vpop.f32.mrf.mxu0 }
 0x564   : > { %v1975_v19 = vrot.slane %v1777_v43, 3 }
 0x565   : > { %v2377_v46 = vpop.f32.mrf.mxu0 }
 0x566   : > { %v1976_v59 = vsel %vm942_vm7, %v1975_v19, %v1974_v49 }
 0x56b   : > { %v1866_v14 = vpop.f32.mrf.mxu0 }
 0x56c   : > { %v1977_v55 = vrot.slane %v1866_v14, 2 }
 0x56d   : > { %v2384_v38 = vpop.f32.mrf.mxu0 }
 0x56e   : > { %v1978_v63 = vsel %vm944_vm8, %v1977_v55, %v1976_v59 }
 0x56f   : > { %v1955_v57 = vpop.f32.mrf.mxu0 }
 0x570   : > { %v1979_v54 = vrot.slane %v1955_v57, 1 }
 0x571   : > { %v2391_v20 = vpop.f32.mrf.mxu0 }
 0x572   : > { %v1980_v21 = vsel %vm946_vm9, %v1979_v54, %v1978_v63 }
 0x573   : > { %1982 = vst.msk [vmem:[%s340_s9] sm:$0xff] %vm374_vm1, %v1980_v21 }
 0x574   : > { %2690 = shalt.err (!%p2687_p5)
}
 0x575   : > { %s2691_s11 = scalar_lea.hbm %s3513_s15, 128  ;;  %s2695_s26 = scalar_lea.hbm %s3557_s5, 256 }
 0x576   : > { %p2692_p7 = scmp.ne.s32.totalorder %s3513_s15, %s2691_s11  ;;  %p2696_p6 = scmp.lt.s32.totalorder %s3513_s15, %s3557_s5 }
 0x577   : > { %p2697_p12 = scmp.lt.s32.totalorder %s2695_s26, %s2691_s11 }
 0x578   : > { %p2693_p8 = pnand %p2692_p7, %p3588_p10 }
 0x579   : > { %p2698_p0 = por %p2697_p12, %p2696_p6 }
 0x57a   : > { %p2694_p2 = pneg %p2693_p8 }
 0x57c   : > { %p2699_p3 = pnand %p2698_p0, %p2694_p2 }
 0x57e   : > { %2702 = shalt.err (!%p2699_p3)
}
 0x57f   : > { %2404 = dma.vmem_to_hbm [thread:$0]  (%p3588_p10), %s2012_s20, 128, %s3513_s15, %s1993_s8  }
 0x580 PF: > { %s2036_s13 = sand.u32 1, %s2745_s21   ;;  %p3589_p11 = scmp.ne.s32.totalorder %s3570_s28, 0 }
 0x581   : > { %p3590_p9 = scmp.ge.s32.totalorder %s2757_s24, 2  ;;  %s2037_s16 = scalar_lea.sflag [#allocation4], %s2036_s13 }
 0x583   : > { %p2423_p13 = pnand %p3590_p9, %p3589_p11 }
 0x585   : > { %p2424_p1 = pneg %p2423_p13 }
 0x587   : > { %2736 = dma.done.wait (%p2424_p1), %s2037_s16, 128  }
 0x588   : > { %2738 = vsyncadd (%p2424_p1), %s2037_s16, 4294967168  ;;  %s2046_s9 = scalar_lea.sflag [#allocation12], %s2036_s13 }
 0x589   : > { %2740 = dma.done.wait (%p2424_p1), %s2046_s9, 128  }
 0x58a   : > { %2742 = vsyncadd (%p2424_p1), %s2046_s9, 4294967168  ;;  %p27_p10 = scmp.ge.s32.totalorder %s2884_s19, 4   ;;  %s3591_s21 = smov %s2749_s22 }
 0x58b   : > { %s3592_s22 = smov %s2753_s23  ;;  %s3593_s23 = smov %s2900_s7 }
 0x58c   : > { %s3594_s24 = smov %s2884_s19  ;;  %29 = sbr.rel (!%p27_p10) target bundleno = 13 (0xd), region = 123 }
 0x591   :  { %2051 = vsyncpa [#allocation3], 1 }
 0x592   :  { %2053 = vsyncpa [#allocation3 + $0x1], 1 }
 0x593   :  { %2054 = vsyncpa [#allocation6], 1 }
 0x594   :  { %2056 = vsyncpa [#allocation6 + $0x1], 1 }
 0x595   :  { %2057 = vsyncpa [#allocation9], 1 }
 0x596   :  { %2058 = vsyncpa [#allocation4], 1 }
 0x597   :  { %2060 = vsyncpa [#allocation4 + $0x1], 1 }
 0x598   :  { %2061 = vsyncpa [#allocation12], 1 }
 0x599   :  { %2063 = vsyncpa [#allocation12 + $0x1], 1 }

</bundles_post_ra>
